<compile_context>
chip_gen: v5e
topology: v5e:2x2
jax: 0.10.0
libtpu: 0.0.40
codegen_flags: <defaults>
</compile_context>

<pallas_src>
import functools
import math

import jax
import jax.numpy as jnp
from jax import lax
from jax.experimental import pallas as pl
from jax.experimental.pallas import tpu as pltpu

LATENT_DIM = 8
HIDDEN = 32
LOG_SIG_MIN = -20.0
LOG_SIG_MAX = 2.0
TANH_EPS = 1e-6
LOG_2PI = math.log(2.0 * math.pi)
PACK_LANES = 128  # lane width of the packed-weights buffer


# ----------------------------------------------------------------------------
# One-time parameter preparation (hoisted out of the per-call hot path):
#   * fuse mean/log_std heads into a single (HIDDEN, 2A) matmul,
#   * drop the unused z_mean half of the encoder output head,
#   * pack everything into one (rows, 128) f32 buffer with 8-row-aligned
#     segment offsets (single const DMA stream, static in-kernel slices).
# ----------------------------------------------------------------------------
def prepare_params(params, latent_dim=LATENT_DIM):
    pol_wh = jnp.concatenate([params["pol_wm"], params["pol_ws"]], axis=1)
    pol_bh = jnp.concatenate([params["pol_bm"], params["pol_bs"]], axis=1)
    enc_w2v = params["enc_w2"][:, latent_dim:]
    enc_b2v = params["enc_b2"][:, latent_dim:]

    segs = [
        ("ew1", params["enc_w1"]), ("eb1", params["enc_b1"]),
        ("ew2", enc_w2v), ("eb2", enc_b2v),
        ("pw1", params["pol_w1"]), ("pb1", params["pol_b1"]),
        ("pw2", params["pol_w2"]), ("pb2", params["pol_b2"]),
        ("pwh", pol_wh), ("pbh", pol_bh),
    ]

    offs, blocks, row = {}, [], 0
    for name, arr in segs:
        r, c = arr.shape
        assert c <= PACK_LANES, f"segment {name} wider than {PACK_LANES} lanes"
        rp = -(-r // 8) * 8  # round rows up to sublane multiple
        blk = jnp.zeros((rp, PACK_LANES), jnp.float32)
        blk = blk.at[:r, :c].set(arr.astype(jnp.float32))
        blocks.append(blk)
        offs[name] = (row, r, c)
        row += rp
    packed = jnp.concatenate(blocks, axis=0)

    return {
        "packed": packed,
        "offs": offs,
        "act_dim": params["pol_wm"].shape[1],
        "obs_dim": params["pol_w1"].shape[0],
        "ctx_dim": params["enc_w1"].shape[0],
    }


# ----------------------------------------------------------------------------
# Fused kernel: TanhGaussianPolicy forward + encoder-variance intrinsic reward.
# One grid step handles Nb obs rows and Cb = (B/G)*S context rows (whole tasks
# only, so the one-step shift never crosses a task boundary inside a block).
# ----------------------------------------------------------------------------
def _fused_kernel(ctx_ref, obs_ref, noise_ref, pack_ref, pol_ref, rew_ref,
                  *, seq_len, act_dim, offs):
    def seg(name):
        r0, r, c = offs[name]
        return pack_ref[r0:r0 + r, :c]

    # ---------------- policy: 2-layer MLP -> fused (mean | log_std) head ----
    x = obs_ref[...].astype(jnp.float32)
    h1 = jnp.maximum(
        jnp.dot(x, seg("pw1"), preferred_element_type=jnp.float32) + seg("pb1"), 0.0)
    h2 = jnp.maximum(
        jnp.dot(h1, seg("pw2"), preferred_element_type=jnp.float32) + seg("pb2"), 0.0)
    heads = jnp.dot(h2, seg("pwh"), preferred_element_type=jnp.float32) + seg("pbh")

    a = act_dim
    mean = heads[:, :a]
    log_std = jnp.clip(heads[:, a:], LOG_SIG_MIN, LOG_SIG_MAX)
    std = jnp.exp(log_std)
    eps = noise_ref[...].astype(jnp.float32)
    pre_tanh = mean + std * eps
    action = jnp.tanh(pre_tanh)
    # Normal(mean, std).log_prob(pre_tanh) = -0.5*eps^2 - log_std - 0.5*log(2*pi)
    log_normal = -0.5 * eps * eps - log_std - 0.5 * LOG_2PI
    # TanhNormal correction: - log(1 - tanh(x)^2 + eps); summed, keepdim
    log_prob = jnp.sum(log_normal - jnp.log(1.0 - action * action + TANH_EPS),
                       axis=-1, keepdims=True)

    # Assemble the whole lane-dense slab in registers and write it with ONE
    # unmasked full-block store: [action | mean | log_std | std | pre_tanh |
    # logp | zero-pad to 128 lanes].
    nrows = x.shape[0]
    wpad = pol_ref.shape[-1]
    used = 5 * a + 1
    parts = [action, mean, log_std, std, pre_tanh, log_prob]
    if wpad > used:
        parts.append(jnp.zeros((nrows, wpad - used), jnp.float32))
    pol_ref[...] = jnp.concatenate(parts, axis=-1)

    # ---------------- encoder (variance head only) -> intrinsic reward ------
    c = ctx_ref[...].astype(jnp.float32)                                # (Cb, Dc)
    he = jnp.maximum(
        jnp.dot(c, seg("ew1"), preferred_element_type=jnp.float32) + seg("eb1"), 0.0)
    var_pre = jnp.dot(he, seg("ew2"), preferred_element_type=jnp.float32) + seg("eb2")
    z_var_next = jax.nn.softplus(var_pre)                               # (Cb, L)
    m_next_col = jnp.mean(jnp.log(z_var_next), axis=-1, keepdims=True)  # (Cb, 1)
    m_next = jnp.transpose(m_next_col)                                  # (1, Cb) lane-dense

    # z_var = ones at each task's first step, z_var_next shifted one step
    # elsewhere.  Block holds whole tasks, so a lane shift + (col % S == 0)
    # mask reproduces the torch.cat([ones, z_var_next])[:, :-1] semantics.
    cb = m_next.shape[-1]
    m_shift = jnp.concatenate(
        [jnp.zeros((1, 1), jnp.float32), m_next[:, :cb - 1]], axis=-1)
    col = lax.broadcasted_iota(jnp.int32, m_next.shape, 1)
    m_prev = jnp.where((col % seq_len) == 0, 0.0, m_shift)
    rew_ref[...] = m_prev - m_next                                      # (1, Cb)


# ----------------------------------------------------------------------------
# Grid selection: only split across a "parallel" axis when the part really has
# two TensorCores (v7x); on single-TC chips a 2-step grid is pure overhead.
# ----------------------------------------------------------------------------
def _num_tensorcores():
    try:
        info = pltpu.get_tpu_info()
    except Exception:
        return 1
    for attr in ("num_cores", "core_count", "tensorcore_count",
                 "num_tensorcores", "cores_per_chip"):
        v = getattr(info, attr, None)
        if isinstance(v, int) and v > 0:
            return v
    return 1


def _pick_grid(B, S, N):
    if _num_tensorcores() < 2:
        return 1
    # Keep every block (8,128)-legal: whole tasks per block, 8-row obs blocks,
    # and a 128-multiple lane block for the reward row.
    if (B % 2 == 0 and N % 2 == 0 and (N // 2) % 8 == 0
            and ((B // 2) * S) % 128 == 0):
        return 2
    return 1


# ----------------------------------------------------------------------------
# ExpAgentIter.forward
# ----------------------------------------------------------------------------
def exp_agent_iter_forward(obs, context, prepared, noise):
    T, Bp, Do = obs.shape
    B, S, Dc = context.shape
    N = T * Bp
    A = prepared["act_dim"]
    assert Do == prepared["obs_dim"] and Dc == prepared["ctx_dim"]

    obs2d = obs.reshape(N, Do)           # contiguous merge, free
    ctx2d = context.reshape(B * S, Dc)   # contiguous merge, free
    packed = prepared["packed"]
    PR = packed.shape[0]

    G = _pick_grid(B, S, N)
    Nb = N // G
    Cb = (B // G) * S
    W = 5 * A + 1
    WPAD = -(-W // 128) * 128            # lane-dense policy slab width

    rows = lambda g: (g, 0)
    const = lambda g: (0, 0)
    lane_blk = lambda g: (0, g)

    kernel = functools.partial(_fused_kernel, seq_len=S, act_dim=A,
                               offs=prepared["offs"])
    pol_slab, rew_row = pl.pallas_call(
        kernel,
        out_shape=(
            jax.ShapeDtypeStruct((N, WPAD), jnp.float32),    # fused policy outputs
            jax.ShapeDtypeStruct((1, B * S), jnp.float32),   # rew, lane-dense row
        ),
        grid=(G,),
        in_specs=[
            pl.BlockSpec((Cb, Dc), rows),          # context (whole tasks per block)
            pl.BlockSpec((Nb, Do), rows),          # obs rows
            pl.BlockSpec((Nb, A), rows),           # reparameterization noise
            pl.BlockSpec((PR, PACK_LANES), const), # packed weights (single stream)
        ],
        out_specs=(
            pl.BlockSpec((Nb, WPAD), rows),
            pl.BlockSpec((1, Cb), lane_blk),
        ),
        compiler_params=pltpu.CompilerParams(
            dimension_semantics=("parallel",)),
    )(ctx2d, obs2d, noise, packed)

    def r3(x2d):
        return x2d.reshape(T, Bp, -1)

    action = r3(pol_slab[:, 0 * A:1 * A])
    mean = r3(pol_slab[:, 1 * A:2 * A])
    log_std = r3(pol_slab[:, 2 * A:3 * A])
    std = r3(pol_slab[:, 3 * A:4 * A])
    pre_tanh = r3(pol_slab[:, 4 * A:5 * A])
    log_prob = r3(pol_slab[:, 5 * A:5 * A + 1])

    # rlkit TanhGaussianPolicy forward tuple:
    # (action, mean, log_std, log_prob, expected_log_prob, std,
    #  mean_action_log_prob, pre_tanh_value)
    policy_outputs = (action, mean, log_std, log_prob, None, std, None, pre_tanh)

    rew = lax.stop_gradient(rew_row.reshape(B, S))   # rew.detach()
    return policy_outputs, rew


if __name__ == "__main__":
    # Small shapes consistent with the module:
    # obs_dim=11, action_dim=4, reward=1 -> context feature dim 16
    # (use_next_obs_in_context=False), latent_dim=8, hidden=32.
    T, Bp, Do = 8, 2, 11
    A = 4
    B, S = 2, 8
    Dc = Do + A + 1

    key = jax.random.PRNGKey(0)
    ks = jax.random.split(key, 12)
    obs = jax.random.normal(ks[0], (T, Bp, Do), jnp.float32)
    context = jax.random.normal(ks[1], (B, S, Dc), jnp.float32)
    noise = jax.random.normal(ks[2], (T * Bp, A), jnp.float32)  # rsample noise

    def init(k, shape, scale=0.1):
        return scale * jax.random.normal(k, shape, jnp.float32)

    params = {
        # context encoder: Dc -> HIDDEN -> 2*latent_dim
        "enc_w1": init(ks[3], (Dc, HIDDEN)),
        "enc_b1": jnp.zeros((1, HIDDEN), jnp.float32),
        "enc_w2": init(ks[4], (HIDDEN, 2 * LATENT_DIM)),
        "enc_b2": jnp.zeros((1, 2 * LATENT_DIM), jnp.float32),
        # policy: Do -> HIDDEN -> HIDDEN -> (mean, log_std)
        "pol_w1": init(ks[5], (Do, HIDDEN)),
        "pol_b1": jnp.zeros((1, HIDDEN), jnp.float32),
        "pol_w2": init(ks[6], (HIDDEN, HIDDEN)),
        "pol_b2": jnp.zeros((1, HIDDEN), jnp.float32),
        "pol_wm": init(ks[7], (HIDDEN, A)),
        "pol_bm": jnp.zeros((1, A), jnp.float32),
        "pol_ws": init(ks[8], (HIDDEN, A)),
        "pol_bs": jnp.zeros((1, A), jnp.float32),
    }

    prepared = prepare_params(params)                  # one-time weight packing
    jax.block_until_ready(prepared["packed"])

    policy_outputs, rew = exp_agent_iter_forward(obs, context, prepared, noise)
    for t in policy_outputs:
        if t is not None:
            jax.block_until_ready(t)
    jax.block_until_ready(rew)

    assert policy_outputs[0].shape == (T, Bp, A)
    assert policy_outputs[3].shape == (T, Bp, 1)
    assert rew.shape == (B, S)
    print("KERNEL_OK")
</pallas_src>

<mosaic_0001>
module attributes {stable_mosaic.version = 11 : i64} {
  func.func @_fused_kernel(%arg0: i32, %arg1: memref<16x16xf32, #tpu.memory_space<vmem>>, %arg2: memref<16x11xf32, #tpu.memory_space<vmem>>, %arg3: memref<16x4xf32, #tpu.memory_space<vmem>>, %arg4: memref<168x128xf32, #tpu.memory_space<vmem>>, %arg5: memref<16x128xf32, #tpu.memory_space<vmem>>, %arg6: memref<1x16xf32, #tpu.memory_space<vmem>>) attributes {dimension_semantics = [#tpu.dimension_semantics<parallel>], iteration_bounds = array<i64: 1>, scalar_prefetch = 0 : i64, scratch_operands = 0 : i64, tpu.core_type = #tpu.core_type<tc>, window_params = [{transform_indices = @transform_0, window_bounds = array<i64: 16, 16>}, {transform_indices = @transform_1, window_bounds = array<i64: 16, 11>}, {transform_indices = @transform_2, window_bounds = array<i64: 16, 4>}, {pipeline_mode = #tpu.pipeline_mode<synchronous>, transform_indices = @transform_3, window_bounds = array<i64: 168, 128>}, {transform_indices = @transform_4, window_bounds = array<i64: 16, 128>}, {transform_indices = @transform_5, window_bounds = array<i64: 1, 16>}]} {
    %c0 = arith.constant 0 : index
    %c0_0 = arith.constant 0 : index
    %0 = vector.load %arg2[%c0, %c0_0] : memref<16x11xf32, #tpu.memory_space<vmem>>, vector<16x11xf32>
    %c64 = arith.constant 64 : index
    %c0_1 = arith.constant 0 : index
    %1 = vector.load %arg4[%c64, %c0_1] : memref<168x128xf32, #tpu.memory_space<vmem>>, vector<11x32xf32>
    %cst = arith.constant dense<0.000000e+00> : vector<16x32xf32>
    %2 = tpu.matmul %0, %1, %cst {dimension_numbers = #tpu.dot_dimension_numbers<[1], [0], [0], [1], [0, 0, 1, 1], [], []>} : vector<16x11xf32>, vector<11x32xf32>, vector<16x32xf32> -> vector<16x32xf32>
    %c80 = arith.constant 80 : index
    %c0_2 = arith.constant 0 : index
    %3 = vector.load %arg4[%c80, %c0_2] : memref<168x128xf32, #tpu.memory_space<vmem>>, vector<1x32xf32>
    %4 = vector.broadcast %3 : vector<1x32xf32> to vector<16x32xf32>
    %5 = arith.addf %2, %4 : vector<16x32xf32>
    %cst_3 = arith.constant 0.000000e+00 : f32
    %6 = vector.broadcast %cst_3 : f32 to vector<16x32xf32>
    %7 = arith.maximumf %5, %6 : vector<16x32xf32>
    %c88 = arith.constant 88 : index
    %c0_4 = arith.constant 0 : index
    %8 = vector.load %arg4[%c88, %c0_4] : memref<168x128xf32, #tpu.memory_space<vmem>>, vector<32x32xf32>
    %cst_5 = arith.constant dense<0.000000e+00> : vector<16x32xf32>
    %9 = tpu.matmul %7, %8, %cst_5 {dimension_numbers = #tpu.dot_dimension_numbers<[1], [0], [0], [1], [0, 0, 1, 1], [], []>} : vector<16x32xf32>, vector<32x32xf32>, vector<16x32xf32> -> vector<16x32xf32>
    %c120 = arith.constant 120 : index
    %c0_6 = arith.constant 0 : index
    %10 = vector.load %arg4[%c120, %c0_6] : memref<168x128xf32, #tpu.memory_space<vmem>>, vector<1x32xf32>
    %11 = vector.broadcast %10 : vector<1x32xf32> to vector<16x32xf32>
    %12 = arith.addf %9, %11 : vector<16x32xf32>
    %cst_7 = arith.constant 0.000000e+00 : f32
    %13 = vector.broadcast %cst_7 : f32 to vector<16x32xf32>
    %14 = arith.maximumf %12, %13 : vector<16x32xf32>
    %c128 = arith.constant 128 : index
    %c0_8 = arith.constant 0 : index
    %15 = vector.load %arg4[%c128, %c0_8] : memref<168x128xf32, #tpu.memory_space<vmem>>, vector<32x8xf32>
    %cst_9 = arith.constant dense<0.000000e+00> : vector<16x8xf32>
    %16 = tpu.matmul %14, %15, %cst_9 {dimension_numbers = #tpu.dot_dimension_numbers<[1], [0], [0], [1], [0, 0, 1, 1], [], []>} : vector<16x32xf32>, vector<32x8xf32>, vector<16x8xf32> -> vector<16x8xf32>
    %c160 = arith.constant 160 : index
    %c0_10 = arith.constant 0 : index
    %17 = vector.load %arg4[%c160, %c0_10] : memref<168x128xf32, #tpu.memory_space<vmem>>, vector<1x8xf32>
    %18 = vector.broadcast %17 : vector<1x8xf32> to vector<16x8xf32>
    %19 = arith.addf %16, %18 : vector<16x8xf32>
    %20 = vector.extract_strided_slice %19 {offsets = [0, 0], sizes = [16, 4], strides = [1, 1]} : vector<16x8xf32> to vector<16x4xf32>
    %21 = vector.extract_strided_slice %19 {offsets = [0, 4], sizes = [16, 4], strides = [1, 1]} : vector<16x8xf32> to vector<16x4xf32>
    %cst_11 = arith.constant -2.000000e+01 : f32
    %cst_12 = arith.constant 2.000000e+00 : f32
    %22 = vector.broadcast %cst_11 : f32 to vector<16x4xf32>
    %23 = arith.maximumf %22, %21 : vector<16x4xf32>
    %24 = vector.broadcast %cst_12 : f32 to vector<16x4xf32>
    %25 = arith.minimumf %24, %23 : vector<16x4xf32>
    %26 = math.exp %25 : vector<16x4xf32>
    %c0_13 = arith.constant 0 : index
    %c0_14 = arith.constant 0 : index
    %27 = vector.load %arg3[%c0_13, %c0_14] : memref<16x4xf32, #tpu.memory_space<vmem>>, vector<16x4xf32>
    %28 = arith.mulf %26, %27 : vector<16x4xf32>
    %29 = arith.addf %20, %28 : vector<16x4xf32>
    %30 = math.tanh %29 : vector<16x4xf32>
    %cst_15 = arith.constant -5.000000e-01 : f32
    %31 = vector.broadcast %cst_15 : f32 to vector<16x4xf32>
    %32 = arith.mulf %31, %27 : vector<16x4xf32>
    %33 = arith.mulf %32, %27 : vector<16x4xf32>
    %34 = arith.subf %33, %25 : vector<16x4xf32>
    %cst_16 = arith.constant 0.918938517 : f32
    %35 = vector.broadcast %cst_16 : f32 to vector<16x4xf32>
    %36 = arith.subf %34, %35 : vector<16x4xf32>
    %37 = arith.mulf %30, %30 : vector<16x4xf32>
    %cst_17 = arith.constant 1.000000e+00 : f32
    %38 = vector.broadcast %cst_17 : f32 to vector<16x4xf32>
    %39 = arith.subf %38, %37 : vector<16x4xf32>
    %cst_18 = arith.constant 9.99999997E-7 : f32
    %40 = vector.broadcast %cst_18 : f32 to vector<16x4xf32>
    %41 = arith.addf %39, %40 : vector<16x4xf32>
    %42 = math.log %41 : vector<16x4xf32>
    %43 = arith.subf %36, %42 : vector<16x4xf32>
    %cst_19 = arith.constant dense<0.000000e+00> : vector<16xf32>
    %44 = vector.multi_reduction <add>, %43, %cst_19 [1] : vector<16x4xf32> to vector<16xf32>
    %45 = vector.shape_cast %44 : vector<16xf32> to vector<16x1xf32>
    %cst_20 = arith.constant 0.000000e+00 : f32
    %46 = vector.broadcast %cst_20 : f32 to vector<16x107xf32>
    %47 = tpu.concatenate %30, %20, %25, %26, %29, %45, %46 in 1 : vector<16x4xf32>, vector<16x4xf32>, vector<16x4xf32>, vector<16x4xf32>, vector<16x4xf32>, vector<16x1xf32>, vector<16x107xf32> -> vector<16x128xf32>
    %c0_21 = arith.constant 0 : index
    %c0_22 = arith.constant 0 : index
    %48 = vector.load %arg5[%c0_21, %c0_22] : memref<16x128xf32, #tpu.memory_space<vmem>>, vector<16x128xf32>
    tpu.vector_store %arg5[%c0_21, %c0_22], %47 {strides = array<i32>} : memref<16x128xf32, #tpu.memory_space<vmem>>, vector<16x128xf32>,
    %c0_23 = arith.constant 0 : index
    %c0_24 = arith.constant 0 : index
    %49 = vector.load %arg1[%c0_23, %c0_24] : memref<16x16xf32, #tpu.memory_space<vmem>>, vector<16x16xf32>
    %c0_25 = arith.constant 0 : index
    %c0_26 = arith.constant 0 : index
    %50 = vector.load %arg4[%c0_25, %c0_26] : memref<168x128xf32, #tpu.memory_space<vmem>>, vector<16x32xf32>
    %cst_27 = arith.constant dense<0.000000e+00> : vector<16x32xf32>
    %51 = tpu.matmul %49, %50, %cst_27 {dimension_numbers = #tpu.dot_dimension_numbers<[1], [0], [0], [1], [0, 0, 1, 1], [], []>} : vector<16x16xf32>, vector<16x32xf32>, vector<16x32xf32> -> vector<16x32xf32>
    %c16 = arith.constant 16 : index
    %c0_28 = arith.constant 0 : index
    %52 = vector.load %arg4[%c16, %c0_28] : memref<168x128xf32, #tpu.memory_space<vmem>>, vector<1x32xf32>
    %53 = vector.broadcast %52 : vector<1x32xf32> to vector<16x32xf32>
    %54 = arith.addf %51, %53 : vector<16x32xf32>
    %cst_29 = arith.constant 0.000000e+00 : f32
    %55 = vector.broadcast %cst_29 : f32 to vector<16x32xf32>
    %56 = arith.maximumf %54, %55 : vector<16x32xf32>
    %c24 = arith.constant 24 : index
    %c0_30 = arith.constant 0 : index
    %57 = vector.load %arg4[%c24, %c0_30] : memref<168x128xf32, #tpu.memory_space<vmem>>, vector<32x8xf32>
    %cst_31 = arith.constant dense<0.000000e+00> : vector<16x8xf32>
    %58 = tpu.matmul %56, %57, %cst_31 {dimension_numbers = #tpu.dot_dimension_numbers<[1], [0], [0], [1], [0, 0, 1, 1], [], []>} : vector<16x32xf32>, vector<32x8xf32>, vector<16x8xf32> -> vector<16x8xf32>
    %c56 = arith.constant 56 : index
    %c0_32 = arith.constant 0 : index
    %59 = vector.load %arg4[%c56, %c0_32] : memref<168x128xf32, #tpu.memory_space<vmem>>, vector<1x8xf32>
    %60 = vector.broadcast %59 : vector<1x8xf32> to vector<16x8xf32>
    %61 = arith.addf %58, %60 : vector<16x8xf32>
    %cst_33 = arith.constant 0.000000e+00 : f32
    %62 = vector.broadcast %cst_33 : f32 to vector<16x8xf32>
    %63 = arith.maximumf %61, %62 : vector<16x8xf32>
    %64 = vector.broadcast %cst_33 : f32 to vector<16x8xf32>
    %65 = arith.subf %61, %64 : vector<16x8xf32>
    %66 = arith.cmpf one, %65, %65 : vector<16x8xf32>
    %67 = vector.broadcast %cst_33 : f32 to vector<16x8xf32>
    %68 = arith.addf %61, %67 : vector<16x8xf32>
    %69 = math.absf %65 : vector<16x8xf32>
    %cst_34 = arith.constant 0.000000e+00 : f32
    %70 = vector.broadcast %cst_34 : f32 to vector<16x8xf32>
    %71 = arith.subf %70, %69 : vector<16x8xf32>
    %72 = math.exp %71 : vector<16x8xf32>
    %73 = math.log1p %72 : vector<16x8xf32>
    %74 = arith.addf %63, %73 : vector<16x8xf32>
    %75 = arith.select %66, %68, %74 : vector<16x8xi1>, vector<16x8xf32>
    %76 = math.log %75 : vector<16x8xf32>
    %cst_35 = arith.constant dense<0.000000e+00> : vector<16xf32>
    %77 = vector.multi_reduction <add>, %76, %cst_35 [1] : vector<16x8xf32> to vector<16xf32>
    %78 = vector.shape_cast %77 : vector<16xf32> to vector<16x1xf32>
    %cst_36 = arith.constant 8.000000e+00 : f32
    %79 = vector.broadcast %cst_36 : f32 to vector<16x1xf32>
    %80 = arith.divf %78, %79 : vector<16x1xf32>
    %81 = tpu.transpose %80, [1, 0] : vector<16x1xf32> -> vector<1x16xf32>
    %cst_37 = arith.constant 0.000000e+00 : f32
    %82 = vector.broadcast %cst_37 : f32 to vector<1x1xf32>
    %83 = vector.extract_strided_slice %81 {offsets = [0, 0], sizes = [1, 15], strides = [1, 1]} : vector<1x16xf32> to vector<1x15xf32>
    %84 = tpu.concatenate %82, %83 in 1 : vector<1x1xf32>, vector<1x15xf32> -> vector<1x16xf32>
    %85 = tpu.iota {dimensions = array<i32: 1>} : vector<1x16xi32>
    %c8_i32 = arith.constant 8 : i32
    %c0_i32 = arith.constant 0 : i32
    %86 = arith.cmpi eq, %c8_i32, %c0_i32 : i32
    %c1_i32 = arith.constant 1 : i32
    %87 = arith.select %86, %c1_i32, %c8_i32 : i32
    %88 = vector.broadcast %87 : i32 to vector<1x16xi32>
    %89 = arith.remsi %85, %88 : vector<1x16xi32>
    %c0_i32_38 = arith.constant 0 : i32
    %90 = vector.broadcast %c0_i32_38 : i32 to vector<1x16xi32>
    %91 = arith.cmpi ne, %89, %90 : vector<1x16xi32>
    %c0_i32_39 = arith.constant 0 : i32
    %92 = vector.broadcast %c0_i32_39 : i32 to vector<1x16xi32>
    %93 = arith.cmpi slt, %89, %92 : vector<1x16xi32>
    %c0_i32_40 = arith.constant 0 : i32
    %94 = arith.cmpi slt, %87, %c0_i32_40 : i32
    %95 = vector.broadcast %94 : i1 to vector<1x16xi1>
    %96 = vector.broadcast %95 : vector<1x16xi1> to vector<1x16xi1>
    %97 = arith.xori %93, %96 : vector<1x16xi1>
    %98 = arith.andi %97, %91 : vector<1x16xi1>
    %99 = vector.broadcast %87 : i32 to vector<1x16xi32>
    %100 = arith.addi %89, %99 : vector<1x16xi32>
    %101 = arith.select %98, %100, %89 : vector<1x16xi1>, vector<1x16xi32>
    %c0_i32_41 = arith.constant 0 : i32
    %102 = vector.broadcast %c0_i32_41 : i32 to vector<1x16xi32>
    %103 = arith.cmpi eq, %101, %102 : vector<1x16xi32>
    %cst_42 = arith.constant 0.000000e+00 : f32
    %104 = vector.broadcast %cst_42 : f32 to vector<1x16xf32>
    %105 = arith.select %103, %104, %84 : vector<1x16xi1>, vector<1x16xf32>
    %106 = arith.subf %105, %81 : vector<1x16xf32>
    %c0_43 = arith.constant 0 : index
    %c0_44 = arith.constant 0 : index
    %107 = vector.load %arg6[%c0_43, %c0_44] : memref<1x16xf32, #tpu.memory_space<vmem>>, vector<1x16xf32>
    tpu.vector_store %arg6[%c0_43, %c0_44], %106 {strides = array<i32>} : memref<1x16xf32, #tpu.memory_space<vmem>>, vector<1x16xf32>,
    return
  }
  func.func @transform_0(%arg0: i32) -> (i32, i32) {
    %c0_i32 = arith.constant 0 : i32
    %c0_i32_0 = arith.constant 0 : i32
    return %arg0, %c0_i32 : i32, i32
  }
  func.func @transform_1(%arg0: i32) -> (i32, i32) {
    %c0_i32 = arith.constant 0 : i32
    %c0_i32_0 = arith.constant 0 : i32
    return %arg0, %c0_i32 : i32, i32
  }
  func.func @transform_2(%arg0: i32) -> (i32, i32) {
    %c0_i32 = arith.constant 0 : i32
    %c0_i32_0 = arith.constant 0 : i32
    return %arg0, %c0_i32 : i32, i32
  }
  func.func @transform_3(%arg0: i32) -> (i32, i32) {
    %c0_i32 = arith.constant 0 : i32
    %c0_i32_0 = arith.constant 0 : i32
    %c0_i32_1 = arith.constant 0 : i32
    return %c0_i32, %c0_i32_0 : i32, i32
  }
  func.func @transform_4(%arg0: i32) -> (i32, i32) {
    %c0_i32 = arith.constant 0 : i32
    %c0_i32_0 = arith.constant 0 : i32
    return %arg0, %c0_i32 : i32, i32
  }
  func.func @transform_5(%arg0: i32) -> (i32, i32) {
    %c0_i32 = arith.constant 0 : i32
    %c0_i32_0 = arith.constant 0 : i32
    return %c0_i32, %arg0 : i32, i32
  }
}

</mosaic_0001>

<bundles_post_ra>
// kernel: tpu_custom_call.1
= control target key start
LH: loop header
LB: loop body
LE: loop exit
PB: predicated region body
PF: predicated region fallthrough
CT: control target
= control target key end

     0   :  { %11 = vsyncpa [#allocation3], 0  ;;  %s802_s0 = inlined_call_operand.vmem [shape: f32[16,16], index: 0, kind: input, shape index: {}]   ;;  %s803_s1 = inlined_call_operand.hbm [shape: f32[16,11], index: 1, kind: input, shape index: {}]   ;;  %s804_s2 = inlined_call_operand.vmem [shape: f32[16,4], index: 2, kind: input, shape index: {}]   ;;  %s805_s3 = inlined_call_operand.hbm [shape: f32[168,128], index: 3, kind: input, shape index: {}]   ;;  %s806_s4 = inlined_call_operand.hbm [shape: f32[16,128], index: 4, kind: output, shape index: {0}]   ;;  %s807_s5 = inlined_call_operand.hbm [shape: f32[1,16], index: 5, kind: output, shape index: {1}]  }
   0x1   :  { %12 = vsyncpa [#allocation6], 0 }
   0x2   :  { %13 = vsyncpa [#allocation4], 0 }
   0x3   :  { %14 = vsyncpa [#allocation9], 0  ;;  %s21_s20 = sshll.u32 %s803_s1, 4  ;;  %s666_s21 = smov [#allocation2]   ;;  %s22_s20 = int_to_ptr.hbm [resolvable:$true] %s21_s20 }
   0x4   :  { %s23_s22 = sshll.u32 %s666_s21, 4  ;;  %s36_s25 = sshll.u32 %s805_s3, 4  ;;  %s24_s22 = int_to_ptr.vmem [resolvable:$true] %s23_s22  ;;  %s37_s25 = int_to_ptr.hbm [resolvable:$true] %s36_s25 }
   0x5   :  { %s667_s26 = smov 128   ;;  %s668_s27 = smov 8  }
   0x6   :  { %29 = dma.hbm_to_vmem [thread:$0]  %s22_s20, 256, %s24_s22, [#allocation3], %s667_s26, %s667_s26, %s668_s27  }
   0x7   :  { %s669_s28 = smov [#allocation5]  }
   0x8   :  { %s38_s29 = sshll.u32 %s669_s28, 4  ;;  %s39_s29 = int_to_ptr.vmem [resolvable:$true] %s38_s29 }
   0x9   :  { %44 = dma.hbm_to_vmem [thread:$0]  %s37_s25, 2688, %s39_s29, [#allocation6], %s667_s26, %s667_s26, %s668_s27  }
   0xa   :  { %658 = dma.done.wait [#allocation3], 256  }
   0xb   :  { %659 = vsyncadd [#allocation3], 4294967040 }
   0xc   :  { %660 = dma.done.wait [#allocation6], 2688  }
   0xd   :  { %661 = vsyncadd [#allocation6], 4294964608  ;;  %vm66_vm0 = vcmask 1042432   ;;  %v56_v0 = vld [vmem:[#allocation5 + $0x48] sm:$0x7]  ;;  %v55_v1 = vld [vmem:[#allocation5 + $0x40] sm:$0xff] }
   0xe   :  { %v53_v2 = vld [vmem:[#allocation2] sm:$0xff]  ;;  %504 = vmatpush.msk.msra.mxu0 %vm66_vm0, %v56_v0  ;;  %517 = vmatpush.msk.msra.mxu3 %vm66_vm0, %v56_v0  ;;  %vm59_vm1 = vcmask 89088   ;;  %v54_v3 = vld [vmem:[#allocation2 + $0x8] sm:$0xff]  ;;  %v97_v5 = vld [vmem:[#allocation5 + $0x68] sm:$0xff]  ;;  %vm273_vm2 = vcmask 130048   ;;  %vm101_vm3 = vcmask 261120  }
   0xf   :  { %v98_v4 = vld [vmem:[#allocation5 + $0x70] sm:$0xff]  ;;  %v96_v6 = vld [vmem:[#allocation5 + $0x60] sm:$0xff]  ;;  %v95_v7 = vld [vmem:[#allocation5 + $0x58] sm:$0xff]  ;;  %s670_s8 = smov 4   ;;  %vm267_vm8 = vcmask 64512   ;;  %s672_s11 = smov 16  }
  0x10   :  { %120 = vmatpush.msra.mxu1 %v98_v4  ;;  %85 = vmatpush.msra.mxu0 %v55_v1  ;;  %v287_v8 = vld [vmem:[#allocation5 + $0x8] sm:$0xff]  ;;  %v286_v9 = vld [vmem:[#allocation5] sm:$0xff]  ;;  %v284_v10 = vld [vmem:[%s802_s0] sm:$0xff]  ;;  %vm228_vm9 = vcmask 31744   ;;  %vm270_vm11 = vcmask 97280   ;;  %vm276_vm12 = vcmask 162816  }
  0x11   :  { %518 = vmatpush.msra.mxu3 %v55_v1  ;;  %505 = vmatmul.msk.f32.vlgmr.msra.gmra.mxu0 %vm59_vm1, %v53_v2  ;;  %v136_v11 = vld [vmem:[#allocation5 + $0x98] sm:$0xff]  ;;  %v531_v13 = vld [vmem:[#allocation5 + $0x50] ss:$0 sm:$0xff]  ;;  %v134_v21 = vld [vmem:[#allocation5 + $0x88] sm:$0xff]  ;;  %vm279_vm13 = vcmask 171008   ;;  %s474_s14 = sshll.u32 %s806_s4, 4  ;;  %s475_s14 = int_to_ptr.hbm [resolvable:$true] %s474_s14 }
  0x12   :  { %506 = vmatmul.msk.f32.vlgmr.msra.gmra.mxu3 %vm59_vm1, %v54_v3  ;;  %121 = vmatpush.msra.mxu1 %v97_v5  ;;  %v285_v12 = vld [vmem:[%s802_s0 + $0x8] sm:$0xff]  ;;  %v135_v20 = vld [vmem:[#allocation5 + $0x90] sm:$0xff]  ;;  %v133_v22 = vld [vmem:[#allocation5 + $0x80] sm:$0xff]  ;;  %s674_s15 = smov [#allocation7]   ;;  %s675_s17 = smov 1   ;;  %vm447_vm14 = vcmask 7168  }
  0x13   :  { %310 = vmatpush.msrb.mxu3 %v287_v8  ;;  %157 = vmatpush.msra.mxu2 %v136_v11  ;;  %v324_v23 = vld [vmem:[#allocation5 + $0x30] sm:$0xff]  ;;  %v323_v25 = vld [vmem:[#allocation5 + $0x28] sm:$0xff]  ;;  %v322_v27 = vld [vmem:[#allocation5 + $0x20] sm:$0xff]  ;;  %s472_s16 = sshll.u32 %s674_s15, 4  ;;  %s676_s18 = smov [#allocation8]   ;;  %vm466_vm0 = vcmask 122880   ;;  %s473_s16 = int_to_ptr.vmem [resolvable:$true] %s472_s16 }
  0x14   :  { %122 = vmatpush.msra.mxu1 %v96_v6  ;;  %345 = vmatpush.msrb.mxu0 %v324_v23  ;;  %v533_v24 = vld [vmem:[#allocation5 + $0x10] ss:$0 sm:$0xff]  ;;  %v321_v30 = vld [vmem:[#allocation5 + $0x18] sm:$0xff]  ;;  %v534_v49 = vld [vmem:[#allocation5 + $0xa0] ss:$0 sm:$0xff]  ;;  %s486_s19 = sshll.u32 %s676_s18, 4  ;;  %s487_s19 = int_to_ptr.vmem [resolvable:$true] %s486_s19 }
  0x15   :  { %311 = vmatpush.msrb.mxu3 %v286_v9  ;;  %158 = vmatpush.msra.mxu2 %v135_v20  ;;  %v732_v28 = vld [vmem:[%s804_s2] sm:$0xff]  ;;  %v740_v32 = vld [vmem:[%s804_s2 + $0x8] sm:$0xff]  ;;  %s671_s2 = smov 124   ;;  %s488_s21 = sshll.u32 %s807_s5, 4  ;;  %s489_s21 = int_to_ptr.hbm [resolvable:$true] %s488_s21 }
  0x16   :  { %123 = vmatpush.msra.mxu1 %v95_v7  ;;  %346 = vmatpush.msrb.mxu0 %v323_v25  ;;  %v532_v36 = vld [vmem:[#allocation5 + $0x78] ss:$0 sm:$0xff] }
  0x17   :  { %159 = vmatpush.msra.mxu2 %v134_v21  ;;  %180 = vrot.lane.b32.xlu0 %v732_v28, %s670_s8  ;;  %v535_v44 = vld [vmem:[#allocation5 + $0x38] ss:$0 sm:$0xff] }
  0x18   :  { %347 = vmatpush.msrb.mxu0 %v322_v27 }
  0x19   :  { %160 = vmatpush.msra.mxu2 %v133_v22 }
  0x1a   :  { %513 = vmatmul.msk.f32.vlgmr.msrb.gmra.mxu3 %vm273_vm2, %v284_v10  ;;  %348 = vmatpush.msrb.mxu0 %v321_v30 }
  0x1f   :  { %182 = vrot.lane.b32.xlu0 %v740_v32, %s670_s8 }
  0x22   :  { %514 = vmatmul.msk.f32.gmra.mxu3 %vm273_vm2, %v285_v12 }
  0x89   :  { %v181_v62 = vpop.permute.xlu0 %180 }
  0x8e   :  { %v87_v14 = vpop.f32.mrf.mxu0 }
  0x8f   :  { %v88_v15 = vadd.f32 %v531_v13, %v87_v14 }
  0x91   :  { %v93_v16 = vmax.f32 %v88_v15, 0.0  ;;  %v183_v7 = vpop.permute.xlu0 %182 }
  0x93   :  { %507 = vmatmul.msk.f32.vlgmr.msra.gmra.mxu1 %vm101_vm3, %v93_v16 }
  0x95   :  { %v90_v17 = vpop.f32.mrf.mxu3 }
  0x96   :  { %v91_v18 = vadd.f32 %v531_v13, %v90_v17 }
  0x98   :  { %v94_v19 = vmax.f32 %v91_v18, 0.0 }
  0x9b   :  { %508 = vmatmul.msk.f32.gmra.mxu1 %vm101_vm3, %v94_v19 }
  0x9d   :  { %v313_v26 = vpop.f32.mrf.mxu3 }
  0x9e   :  { %v314_v29 = vadd.f32 %v533_v24, %v313_v26 }
  0xa0   :  { %v319_v31 = vmax.f32 %v314_v29, 0.0 }
  0xa2   :  { %515 = vmatmul.msk.f32.vlgmr.msrb.gmra.mxu0 %vm101_vm3, %v319_v31 }
  0xa5   :  { %v316_v33 = vpop.f32.mrf.mxu3 }
  0xa6   :  { %v317_v34 = vadd.f32 %v533_v24, %v316_v33 }
  0xa8   :  { %v320_v35 = vmax.f32 %v317_v34, 0.0 }
  0xaa   :  { %516 = vmatmul.msk.f32.gmra.mxu0 %vm101_vm3, %v320_v35 }
 0x110   :  { %v125_v37 = vpop.f32.mrf.mxu1 }
 0x111   :  { %v126_v38 = vadd.f32 %v532_v36, %v125_v37 }
 0x113   :  { %v131_v39 = vmax.f32 %v126_v38, 0.0 }
 0x115   :  { %509 = vmatmul.msk.f32.vlgmr.msra.gmra.mxu2 %vm101_vm3, %v131_v39 }
 0x118   :  { %v128_v40 = vpop.f32.mrf.mxu1 }
 0x119   :  { %v129_v41 = vadd.f32 %v532_v36, %v128_v40 }
 0x11b   :  { %v132_v42 = vmax.f32 %v129_v41, 0.0 }
 0x11d   :  { %510 = vmatmul.msk.f32.gmra.mxu2 %vm101_vm3, %v132_v42 }
 0x11f   :  { %v350_v43 = vpop.f32.mrf.mxu0 }
 0x120   :  { %v749_v53 = vadd.f32 %v535_v44, %v350_v43 }
 0x122   :  { %v362_v56 = vand.u32 2147483647, %v749_v53  ;;  %v356_v27 = vmax.f32 %v749_v53, 0.0  ;;  %vm358_vm7 = vcmp.ne.f32.partialorder %v749_v53, %v749_v53 }
 0x124   :  { %v364_v61 = vsub.f32 0.0, %v362_v56 }
 0x126   :  { %v366_v2 = vmul.f32 1.442695, %v364_v61 }
 0x127   :  { %v353_v45 = vpop.f32.mrf.mxu0 }
 0x128   :  { %v354_v46 = vadd.f32 %v535_v44, %v353_v45  ;;  %v200_v45 = vmul.f32 -0.5, %v732_v28 }
 0x12a   :  { %v363_v47 = vand.u32 2147483647, %v354_v46  ;;  %v357_v17 = vmax.f32 %v354_v46, 0.0  ;;  %vm359_vm5 = vcmp.ne.f32.partialorder %v354_v46, %v354_v46 }
 0x12c   :  { %v365_v48 = vsub.f32 0.0, %v363_v47 }
 0x12e   :  { %v368_v50 = vmul.f32 1.442695, %v365_v48  ;;  %v202_v48 = vmul.f32 %v200_v45, %v732_v28 }
 0x130   :  { %536 = vpow2.f32 %v368_v50 }
 0x136   :  { %v537_v59 = vpop.eup %536 }
 0x137   :  { %v379_v0 = vadd.f32 1.0, %v537_v59  ;;  %v382_v6 = vmul.f32 -0.5, %v537_v59  ;;  %v385_v11 = vand.u32 2147483647, %v537_v59 }
 0x139   :  { %v383_v9 = vadd.f32 1.0, %v382_v6  ;;  %vm386_vm4 = vcmp.lt.f32.partialorder %v385_v11, 0.0004427343 }
 0x13b   :  { %v384_v15 = vmul.f32 %v537_v59, %v383_v9 }
 0x198   :  { %v162_v51 = vpop.f32.mrf.mxu2 }
 0x199   :  { %v747_v52 = vadd.f32 %v534_v49, %v162_v51 }
 0x19b   :  { %237 = vrot.lane.b32.xlu0 %v747_v52, %s670_s8  ;;  %v168_v54 = vmax.f32 %v747_v52, -20.0 }
 0x19d   :  { %v754_v55 = vmin.f32 %v168_v54, 2.0 }
 0x19f   :  { %206 = vrot.lane.b32.xlu2 %v754_v55, %s671_s2  ;;  %v172_v57 = vmul.f32 1.442695, %v754_v55 }
 0x1a0   :  { %v165_v58 = vpop.f32.mrf.mxu2 }
 0x1a1   :  { %v760_v60 = vadd.f32 %v534_v49, %v165_v58  ;;  %538 = vpow2.f32 %v172_v57  ;;  %v201_v58 = vmul.f32 -0.5, %v740_v32 }
 0x1a2   :  { %540 = vlog2.f32 %v379_v0 }
 0x1a3   :  { %v169_v63 = vmax.f32 %v760_v60, -20.0  ;;  %v203_v28 = vmul.f32 %v201_v58, %v740_v32 }
 0x1a5   :  { %v171_v1 = vmin.f32 %v169_v63, 2.0 }
 0x1a7   :  { %v539_v3 = vpop.eup %538  ;;  %208 = vrot.lane.b32.xlu2 %v171_v1, %s671_s2  ;;  %v174_v4 = vmul.f32 1.442695, %v171_v1  ;;  %245 = vrot.lane.b32.xlu0 %v171_v1, %s670_s8 }
 0x1a8   :  { %v186_v5 = vmul.f32 %v539_v3, %v181_v62  ;;  %v541_v8 = vpop.eup %540 }
 0x1a9   :  { %542 = vpow2.f32 %v174_v4  ;;  %v381_v14 = vmul.f32 0.6931472, %v541_v8 }
 0x1aa   :  { %544 = vpow2.f32 %v366_v2  ;;  %190 = vrot.lane.b32.xlu1 %v186_v5, %s671_s2 }
 0x1ab   :  { %v387_v18 = vsel %vm386_vm4, %v384_v15, %v381_v14 }
 0x1ac   :  { %v389_v20 = vadd.f32 %v387_v18, %v357_v17 }
 0x1ae   :  { %v391_v23 = vsel %vm359_vm5, %v354_v46, %v389_v20 }
 0x1af   :  { %v543_v10 = vpop.eup %542 }
 0x1b0   :  { %v545_v12 = vpop.eup %544  ;;  %v187_v13 = vmul.f32 %v543_v10, %v183_v7  ;;  %253 = vrot.lane.b32.xlu0 %v543_v10, %s668_s27 }
 0x1b1   :  { %v370_v16 = vadd.f32 1.0, %v545_v12  ;;  %v373_v19 = vmul.f32 -0.5, %v545_v12  ;;  %v376_v24 = vand.u32 2147483647, %v545_v12 }
 0x1b2   :  { %192 = vrot.lane.b32.xlu1 %v187_v13, %s671_s2 }
 0x1b3   :  { %546 = vlog2.f32 %v370_v16  ;;  %v374_v21 = vadd.f32 1.0, %v373_v19  ;;  %vm377_vm6 = vcmp.lt.f32.partialorder %v376_v24, 0.0004427343 }
 0x1b4   :  { %548 = vlog2.f32 %v391_v23 }
 0x1b5   :  { %v375_v26 = vmul.f32 %v545_v12, %v374_v21 }
 0x1b9   :  { %v547_v22 = vpop.eup %546 }
 0x1ba   :  { %v372_v25 = vmul.f32 0.6931472, %v547_v22  ;;  %v549_v30 = vpop.eup %548 }
 0x1bb   :  { %v395_v33 = vmul.f32 0.6931472, %v549_v30 }
 0x1bc   :  { %v378_v29 = vsel %vm377_vm6, %v375_v26, %v372_v25 }
 0x1bd   :  { %v388_v31 = vadd.f32 %v378_v29, %v356_v27  ;;  %v399_v35 = vsel %vm267_vm8, %v395_v33, 0.0 }
 0x1bf   :  { %v390_v34 = vsel %vm358_vm7, %v749_v53, %v388_v31 }
 0x1c0   :  { %550 = vlog2.f32 %v390_v34 }
 0x1c6   :  { %v551_v36 = vpop.eup %550 }
 0x1c7   :  { %v393_v37 = vmul.f32 0.6931472, %v551_v36 }
 0x1c9   :  { %v396_v38 = vsel %vm267_vm8, %v393_v37, 0.0 }
 0x1d0   :  { %400 = vadd.xlane.f32.xlu2 %v399_v35 }
 0x1dc   :  { %397 = vadd.xlane.f32.xlu1 %v396_v38 }
 0x1e8   :  { %243 = vrot.lane.b32.xlu2 %v754_v55, %s670_s8 }
 0x1f5   :  { %239 = vrot.lane.b32.xlu1 %v760_v60, %s670_s8 }
 0x1f9   :  { %v207_v49 = vpop.permute.xlu2 %206 }
 0x1fd   :  { %251 = vrot.lane.b32.xlu1 %v539_v3, %s668_s27  ;;  %v673_v3 = vmov 8.0  }
 0x201   :  { %v209_v61 = vpop.permute.xlu2 %208 }
 0x202   :  { %v213_v63 = vsub.f32 %v203_v28, %v209_v61 }
 0x204   :  { %v512_v1 = vadd.f32 -0.9189385, %v213_v63 }
 0x20d   :  { %v238_v14 = vpop.permute.xlu0 %237 }
 0x219   :  { %v246_v15 = vpop.permute.xlu0 %245 }
 0x21c   :  { %v191_v39 = vpop.permute.xlu1 %190 }
 0x21d   :  { %v196_v40 = vadd.f32 %v191_v39, %v747_v52  ;;  %v212_v52 = vsub.f32 %v202_v48, %v207_v49  ;;  %v449_v39 = vlaneseq }
 0x21f   :  { %552 = vtanh.f32 %v196_v40  ;;  %259 = vrot.lane.b32.xlu2 %v196_v40, %s672_s11  ;;  %v511_v56 = vadd.f32 -0.9189385, %v212_v52  ;;  %v450_v40 = vand.u32 127, %v449_v39 }
 0x222   :  { %v254_v18 = vpop.permute.xlu0 %253 }
 0x224   :  { %v193_v41 = vpop.permute.xlu1 %192 }
 0x225   :  { %v553_v42 = vpop.eup %552  ;;  %v197_v43 = vadd.f32 %v193_v41, %v760_v60  ;;  %v455_v41 = vand.u32 7, %v450_v40 }
 0x226   :  { %v216_v44 = vmul.f32 %v553_v42, %v553_v42  ;;  %v265_v20 = vsel %vm228_vm9, %v553_v42, %v238_v14 }
 0x227   :  { %554 = vtanh.f32 %v197_v43  ;;  %261 = vrot.lane.b32.xlu1 %v197_v43, %s672_s11  ;;  %vm463_vm15 = vcmp.eq.s32.totalorder %v455_v41, 0 }
 0x228   :  { %v218_v46 = vsub.f32 1.0, %v216_v44 }
 0x22a   :  { %v220_v47 = vadd.f32 1e-06, %v218_v46 }
 0x22c   :  { %556 = vlog2.f32 %v220_v47 }
 0x22d   :  { %v555_v50 = vpop.eup %554 }
 0x22e   :  { %v217_v51 = vmul.f32 %v555_v50, %v555_v50 }
 0x230   :  { %v219_v53 = vsub.f32 1.0, %v217_v51 }
 0x232   :  { %v557_v54 = vpop.eup %556  ;;  %v221_v55 = vadd.f32 1e-06, %v219_v53 }
 0x233   :  { %v223_v57 = vmul.f32 0.6931472, %v557_v54 }
 0x234   :  { %558 = vlog2.f32 %v221_v55 }
 0x235   :  { %v226_v59 = vsub.f32 %v511_v56, %v223_v57  ;;  %560 = vrcp.f32 %v673_v3 }
 0x237   :  { %v229_v60 = vsel %vm228_vm9, %v226_v59, 0.0 }
 0x238   :  { %230 = vadd.xlane.f32.xlu0 %v229_v60 }
 0x23a   :  { %v559_v62 = vpop.eup %558 }
 0x23b   :  { %v225_v0 = vmul.f32 0.6931472, %v559_v62  ;;  %v561_v5 = vpop.eup %560 }
 0x23c   :  { %v403_v6 = vmul.f32 8.0, %v561_v5  ;;  %vm407_vm10 = vweird.f32 %v561_v5 }
 0x23d   :  { %v227_v2 = vsub.f32 %v512_v1, %v225_v0 }
 0x23e   :  { %v404_v7 = vsub.f32 1.0, %v403_v6 }
 0x23f   :  { %v232_v4 = vsel %vm228_vm9, %v227_v2, 0.0 }
 0x240   :  { %v405_v8 = vmul.f32 %v561_v5, %v404_v7 }
 0x242   :  { %v406_v9 = vadd.f32 %v561_v5, %v405_v8 }
 0x243   :  { %v401_v12 = vpop.xlane.xlu2 %400 }
 0x244   :  { %v408_v11 = vsel %vm407_vm10, %v561_v5, %v406_v9 }
 0x245   :  { %v410_v13 = vmul.f32 %v408_v11, %v401_v12 }
 0x248   :  { %233 = vadd.xlane.f32.xlu2 %v232_v4 }
 0x24b   :  { %v244_v17 = vpop.permute.xlu2 %243 }
 0x24c   :  { %v268_v22 = vsel %vm267_vm8, %v265_v20, %v244_v17 }
 0x24f   :  { %v398_v10 = vpop.xlane.xlu1 %397 }
 0x250   :  { %v409_v32 = vmul.f32 %v408_v11, %v398_v10 }
 0x261   :  { %411 = vxpose.xlu0.b32.start [1/2] (short) (narrow) %v409_v32, 8 }
 0x267   :  { %v240_v16 = vpop.permute.xlu1 %239 }
 0x268   :  { %v266_v29 = vsel %vm228_vm9, %v555_v50, %v240_v16 }
 0x269   :  { %412 = vxpose.xlu0.b32.end [2/2] (short) (narrow) %v410_v13, 8  ;;  %v269_v30 = vsel %vm267_vm8, %v266_v29, %v246_v15 }
 0x26a   :  { %v272_v33 = vsel %vm270_vm11, %v269_v30, %v254_v18 }
 0x26f   :  { %v252_v19 = vpop.permute.xlu1 %251 }
 0x270   :  { %v271_v23 = vsel %vm270_vm11, %v268_v22, %v252_v19 }
 0x279   :  { %v260_v21 = vpop.permute.xlu2 %259 }
 0x27a   :  { %v274_v24 = vsel %vm273_vm2, %v271_v23, %v260_v21 }
 0x299   :  { %v262_v31 = vpop.permute.xlu1 %261 }
 0x29a   :  { %v275_v34 = vsel %vm273_vm2, %v272_v33, %v262_v31 }
 0x2ab   :  { %v231_v25 = vpop.xlane.xlu0 %230 }
 0x2ac   :  { %v277_v26 = vsel %vm276_vm12, %v274_v24, %v231_v25 }
 0x2ad   :  { %v280_v27 = vsel %vm279_vm13, %v277_v26, 0.0 }
 0x2ae   :  { %282 = vst [vmem:[#allocation7] sm:$0xff] %v280_v27 }
 0x2bb   :  { %v234_v35 = vpop.xlane.xlu2 %233 }
 0x2bc   :  { %v278_v36 = vsel %vm276_vm12, %v275_v34, %v234_v35 }
 0x2bd   :  { %v281_v37 = vsel %vm279_vm13, %v278_v36, 0.0 }
 0x2be   :  { %283 = vst [vmem:[#allocation7 + $0x8] sm:$0xff] %v281_v37 }
 0x2bf   :  { %480 = dma.vmem_to_hbm [thread:$0]  %s473_s16, 256, %s475_s14, [#allocation4], %s667_s26, %s667_s26, %s668_s27  }
 0x305   :  { %v427_v38 = vpop.trf.xlu0 }
 0x306   :  { %444 = vrot.lane.b32.xlu2 %v427_v38, %s675_s17 }
 0x360   :  { %v445_v42 = vpop.permute.xlu2 %444 }
 0x361   :  { %v448_v43 = vsel %vm447_vm14, 0.0, %v445_v42 }
 0x362   :  { %v464_v44 = vsel %vm463_vm15, 0.0, %v448_v43 }
 0x363   :  { %v465_v45 = vsub.f32 %v464_v44, %v427_v38 }
 0x365   :  { %467 = vst.msk [vmem:[#allocation8] sm:$0x1] %vm466_vm0, %v465_v45 }
 0x366   :  { %491 = dma.vmem_to_hbm [thread:$0]  %s487_s19, 16, %s489_s21, [#allocation9]  }
 0x367   :  { %662 = dma.done.wait [#allocation4], 256  }
 0x368   :  { %663 = vsyncadd [#allocation4], 4294967040 }
 0x369   :  { %664 = dma.done.wait [#allocation9], 16  }
 0x36a   :  { %665 = vsyncadd [#allocation9], 4294967280 }
 0x36b   :  { %500 = vsyncpa [#allocation3], 1 }
 0x36c   :  { %501 = vsyncpa [#allocation6], 1 }
 0x36d   :  { %502 = vsyncpa [#allocation4], 1 }
 0x36e   :  { %503 = vsyncpa [#allocation9], 1 }

</bundles_post_ra>
